<compile_context>
chip_gen: v5e
topology: v5e:2x2
jax: 0.10.0
libtpu: 0.0.40
codegen_flags: <defaults>
</compile_context>

<pallas_src>
import math

import jax
import jax.numpy as jnp
from jax.experimental import pallas as pl
from jax.experimental.pallas import tpu as pltpu

_LANE_W = 512          # slab width (multiple of 128 lanes)
_TILE_ROWS_CAP = 2048  # (2048, 512) f32 = 4 MiB per block


def _mynet_kernel(c_ref, x_ref, p1_ref):
    # c_ref : SMEM (2,)            [dw, db]   fused affine for the logit diff
    # x_ref : VMEM (TR, _LANE_W)   lane-dense input tile
    # p1_ref: VMEM (TR, _LANE_W)   P(class==1);  P(class==0) = 1 - p1 (in XLA)
    z = x_ref[...] * c_ref[0] + c_ref[1]
    p1_ref[...] = jax.nn.sigmoid(z)   # softmax([l0,l1])[1] == sigmoid(l1-l0)


def _fused_consts(w1, b1, w2, b2):
    W = (w1 @ w2).reshape(2)          # (2,)
    B = (b1 @ w2 + b2).reshape(2)     # (2,)
    return W[1] - W[0], B[1] - B[0]   # dw, db


def mynet_forward(x, w1, b1, w2, b2, *, min_pallas_n=1024):
    """fc1(1->3) -> fc2(3->2) -> softmax(-1) -> view(-1, 2). Returns (N, 2) f32."""
    x = x.reshape(-1).astype(jnp.float32)
    N = x.shape[0]
    dw, db = _fused_consts(w1, b1, w2, b2)

    # Fast path: tiny batches — pallas launch/packing would be pure overhead.
    if N < min_pallas_n:
        p1 = jax.nn.sigmoid(x * dw + db)
        return jnp.stack([1.0 - p1, p1], axis=-1)

    # ---- lane-dense packing: (rows, _LANE_W) f32 slab ----
    rows_needed = -(-N // _LANE_W)
    if rows_needed <= 8:
        tile_rows = 8
    else:
        # Prefer >= 2 tiles (v7x dual-TC sharding), capped for VMEM budget.
        tile_rows = min(_TILE_ROWS_CAP, ((-(-rows_needed // 2) + 7) // 8) * 8)
    num_tiles = -(-rows_needed // tile_rows)
    rows = num_tiles * tile_rows
    total = rows * _LANE_W

    if total == N:
        x_slab = x.reshape(rows, _LANE_W)                 # free reshape, no copy
    else:
        # single pad pass over the tail (no zeros-alloc + scatter round-trip)
        x_slab = jnp.pad(x, (0, total - N)).reshape(rows, _LANE_W)

    consts = jnp.stack([dw, db]).astype(jnp.float32)      # (2,) -> SMEM

    p1_slab = pl.pallas_call(
        _mynet_kernel,
        out_shape=jax.ShapeDtypeStruct((rows, _LANE_W), jnp.float32),
        grid=(num_tiles,),
        in_specs=[
            pl.BlockSpec(memory_space=pltpu.MemorySpace.SMEM),     # consts
            pl.BlockSpec((tile_rows, _LANE_W), lambda i: (i, 0)),  # x tile
        ],
        out_specs=pl.BlockSpec((tile_rows, _LANE_W), lambda i: (i, 0)),
        compiler_params=pltpu.CompilerParams(
            dimension_semantics=("parallel",),
            vmem_limit_bytes=40 * 1024 * 1024,   # covers v5e's 16 MiB default
        ),
    )(consts, x_slab)

    # Padded tail probabilities are garbage; slice them off, then build (N, 2)
    # in one XLA op with `1 - p1` fused into the stack.
    p1 = p1_slab.reshape(-1)[:N]
    return jnp.stack([1.0 - p1, p1], axis=-1)


def init_params(key):
    """Deterministic init matching nn.Linear's U(-1/sqrt(fan_in), 1/sqrt(fan_in))."""
    k1, k2, k3, k4 = jax.random.split(key, 4)
    bound1 = 1.0 / math.sqrt(1.0)  # fc1 fan_in = 1
    bound2 = 1.0 / math.sqrt(3.0)  # fc2 fan_in = 3
    # Stored as (in_features, out_features) so the forward does x @ W.
    w1 = jax.random.uniform(k1, (1, 3), jnp.float32, -bound1, bound1)
    b1 = jax.random.uniform(k2, (3,), jnp.float32, -bound1, bound1)
    w2 = jax.random.uniform(k3, (3, 2), jnp.float32, -bound2, bound2)
    b2 = jax.random.uniform(k4, (2,), jnp.float32, -bound2, bound2)
    return w1, b1, w2, b2


def _reference_forward(x, w1, b1, w2, b2):
    """Pure-JAX reference: fc1 -> fc2 -> softmax(-1) (unfused)."""
    x = x.reshape(-1, 1).astype(jnp.float32)
    h = x @ w1 + b1
    logits = h @ w2 + b2
    return jax.nn.softmax(logits, axis=-1)


if __name__ == "__main__":
    key = jax.random.PRNGKey(0)
    pkey, xkey1, xkey2 = jax.random.split(key, 3)

    w1, b1, w2, b2 = init_params(pkey)

    # --- Test 1: variadic semantics of mynet.forward(*inp): 8 tensors of (1,) ---
    inps = [jax.random.normal(jax.random.fold_in(xkey1, i), (1,), jnp.float32)
            for i in range(8)]
    x_small = jnp.stack(inps)                       # torch.stack(inp) -> (8, 1)
    out_small = jax.block_until_ready(mynet_forward(x_small, w1, b1, w2, b2))
    assert out_small.shape == (8, 2)
    assert jnp.allclose(jnp.sum(out_small, axis=-1), 1.0, atol=1e-5)
    ref_small = _reference_forward(x_small, w1, b1, w2, b2)
    assert jnp.allclose(out_small, ref_small, atol=1e-5)

    # --- Test 2: Pallas path (multi-tile grid + tail padding) ---
    N = 70000
    x_big = jax.random.normal(xkey2, (N,), jnp.float32)
    out_big = jax.block_until_ready(mynet_forward(x_big, w1, b1, w2, b2))
    assert out_big.shape == (N, 2)
    assert jnp.allclose(jnp.sum(out_big, axis=-1), 1.0, atol=1e-5)
    ref_big = _reference_forward(x_big, w1, b1, w2, b2)
    assert jnp.allclose(out_big, ref_big, atol=1e-5), "mismatch vs. reference softmax"

    print("KERNEL_OK")
</pallas_src>

<mosaic_0001>
module attributes {stable_mosaic.version = 11 : i64} {
  func.func @_mynet_kernel(%arg0: i32, %arg1: memref<2xf32, #tpu.memory_space<smem>>, %arg2: memref<72x512xf32, #tpu.memory_space<vmem>>, %arg3: memref<72x512xf32, #tpu.memory_space<vmem>>) attributes {dimension_semantics = [#tpu.dimension_semantics<parallel>], iteration_bounds = array<i64: 2>, scalar_prefetch = 0 : i64, scratch_operands = 0 : i64, tpu.core_type = #tpu.core_type<tc>, window_params = [{transform_indices = @transform_0, window_bounds = array<i64: 2>}, {transform_indices = @transform_1, window_bounds = array<i64: 72, 512>}, {transform_indices = @transform_2, window_bounds = array<i64: 72, 512>}]} {
    %c0 = arith.constant 0 : index
    %c0_0 = arith.constant 0 : index
    %0 = vector.load %arg2[%c0, %c0_0] : memref<72x512xf32, #tpu.memory_space<vmem>>, vector<72x512xf32>
    %c0_1 = arith.constant 0 : index
    %1 = memref.load %arg1[%c0_1] : memref<2xf32, #tpu.memory_space<smem>>
    %2 = vector.broadcast %1 : f32 to vector<72x512xf32>
    %3 = arith.mulf %0, %2 : vector<72x512xf32>
    %c1 = arith.constant 1 : index
    %4 = memref.load %arg1[%c1] : memref<2xf32, #tpu.memory_space<smem>>
    %5 = vector.broadcast %4 : f32 to vector<72x512xf32>
    %6 = arith.addf %3, %5 : vector<72x512xf32>
    %7 = arith.negf %6 : vector<72x512xf32>
    %8 = math.exp %7 : vector<72x512xf32>
    %cst = arith.constant 1.000000e+00 : f32
    %9 = vector.broadcast %cst : f32 to vector<72x512xf32>
    %10 = arith.addf %9, %8 : vector<72x512xf32>
    %11 = arith.divf %9, %10 : vector<72x512xf32>
    %c0_2 = arith.constant 0 : index
    %c0_3 = arith.constant 0 : index
    %12 = vector.load %arg3[%c0_2, %c0_3] : memref<72x512xf32, #tpu.memory_space<vmem>>, vector<72x512xf32>
    tpu.vector_store %arg3[%c0_2, %c0_3], %11 {strides = array<i32>} : memref<72x512xf32, #tpu.memory_space<vmem>>, vector<72x512xf32>,
    return
  }
  func.func @transform_0(%arg0: i32) -> i32 {
    %c0_i32 = arith.constant 0 : i32
    %c0_i32_0 = arith.constant 0 : i32
    return %c0_i32 : i32
  }
  func.func @transform_1(%arg0: i32) -> (i32, i32) {
    %c0_i32 = arith.constant 0 : i32
    %c0_i32_0 = arith.constant 0 : i32
    return %arg0, %c0_i32 : i32, i32
  }
  func.func @transform_2(%arg0: i32) -> (i32, i32) {
    %c0_i32 = arith.constant 0 : i32
    %c0_i32_0 = arith.constant 0 : i32
    return %arg0, %c0_i32 : i32, i32
  }
}

</mosaic_0001>

<bundles_post_ra>
// kernel: tpu_custom_call.1
= control target key start
LH: loop header
LB: loop body
LE: loop exit
PB: predicated region body
PF: predicated region fallthrough
CT: control target
= control target key end

     0   :  { %7 = vsyncpa [#allocation5], 0  ;;  %s2521_s0 = inlined_call_operand.hbm [shape: f32[2], index: 0, kind: input, shape index: {}]   ;;  %s2522_s1 = inlined_call_operand.hbm [shape: f32[144,512], index: 1, kind: input, shape index: {}]   ;;  %s2523_s2 = inlined_call_operand.hbm [shape: f32[144,512], index: 2, kind: output, shape index: {}]  }
   0x1   :  { %8 = vsyncpa [#allocation3], 0 }
   0x2   :  { %10 = vsyncpa [#allocation3 + $0x1], 0 }
   0x3   :  { %11 = vsyncpa [#allocation4], 0 }
   0x4   :  { %13 = vsyncpa [#allocation4 + $0x1], 0  ;;  %s1514_s9 = smov 0   ;;  %s1516_s10 = smov 0  }
   0x5   :  { %s1518_s11 = smov 0   ;;  %s1520_s12 = smov 0  }
   0x6 LB: > { %s1535_s13 = sadd.s32 4294967295, %s1492_s12   ;;  %s1115_s14 = sadd.s32 4294967294, %s1492_s12   ;;  %s1492_s12 = sphi %s1520_s12, %s2657_s12   ;;  %s1488_s11 = sphi %s1518_s11, %s2656_s11   ;;  %s1484_s10 = sphi %s1516_s10, %s2655_s10   ;;  %s1480_s9 = sphi %s1514_s9, %s2654_s9  }
   0x7   : > { %s1539_s15 = sadd.s32 1, %s1492_s12   ;;  %s47_s16 = sadd.s32 1, %s1488_s11 }
   0x8   : > { %s44_s17 = ssub.s32 %s1492_s12, %s1539_s15  ;;  %p54_p0 = scmp.ne.s32.totalorder %s1488_s11, %s1484_s10 }
   0x9   : > { %p45_p1 = scmp.eq.s32.totalorder %s44_s17, 0  ;;  %p55_p2 = scmp.eq.s32.totalorder %s1492_s12, 0 }
   0xa   : > { %p60_p3 = scmp.ne.s32.totalorder %s1484_s10, %s1480_s9  ;;  %p61_p4 = scmp.eq.s32.totalorder %s1535_s13, 0 }
   0xb   : > { %s1551_s18 = scalar_select %p45_p1, %s1488_s11, %s47_s16  }
   0xc   : > { %p1553_p5 = por %p55_p2, %p54_p0  ;;  %p1559_p6 = por %p61_p4, %p60_p3 }
   0xd   : > { %p84_p7 = scmp.eq.s32.totalorder %s1535_s13, 1  ;;  %p90_p8 = scmp.eq.s32.totalorder %s1115_s14, 1 }
   0xe   : > { %p1116_p9 = scmp.ge.s32.totalorder %s1492_s12, 1  ;;  %p97_p10 = scmp.lt.s32.totalorder %s1492_s12, 3 }
   0xf   : > { %p1566_p11 = por %p84_p7, %p54_p0  ;;  %p1570_p12 = por %p90_p8, %p60_p3 }
  0x10   : > { %p1574_p13 = pnand %p1116_p9, %p97_p10  ;;  %s109_s26 = sshll.u32 %s2521_s0, 4  ;;  %s110_s26 = int_to_ptr.hbm [resolvable:$true] %s109_s26 }
  0x11   : > { %p1193_p2 = scmp.lt.s32.totalorder %s1492_s12, 2  ;;  %s120_s27 = sand.u32 1, %s1488_s11  }
  0x12   : > { %p1180_p1 = pneg %p1574_p13  ;;  %s1170_s29 = smul.u32 288, %s120_s27 }
  0x13   : > { %p1590_p3 = pnand %p1193_p2, %p1553_p5  ;;  %s1494_s30 = smov [#allocation2]  }
  0x14   : > { %p1181_p7 = pnand %p1180_p1, %p61_p4  ;;  %s1168_s3 = smul.u32 288, %s1492_s12 }
  0x15   : > { %s124_s4 = scalar_lea.vmem [#allocation6], %s1170_s29  ;;  %s121_s16 = scalar_lea.sflag [#allocation3], %s120_s27 }
  0x16   : > { %1183 = dma.hbm_to_smem (!%p1181_p7), %s110_s26, 16, %s1494_s30, [#allocation5]  }
  0x17   : > { %s133_s5 = sshll.u32 %s124_s4, 4  ;;  %s130_s8 = scalar_lea.hbm %s2522_s1, %s1168_s3  ;;  %s134_s5 = int_to_ptr.vmem [resolvable:$true] %s133_s5 }
  0x18   : > { %s131_s14 = sshll.u32 %s130_s8, 4  ;;  %p1396_p8 = pneg %p1590_p3  ;;  %s132_s14 = int_to_ptr.hbm [resolvable:$true] %s131_s14 }
  0x19   : > { %s1392_s17 = sshra.s32 %s132_s14, 4  ;;  %s1399_s26 = scalar_lea.hbm %s2522_s1, 576  ;;  %s1393_s17 = int_to_ptr.hbm [resolvable:$true] %s1392_s17 }
  0x1a   : > { %s1394_s19 = scalar_lea.hbm %s1393_s17, 288  ;;  %p1400_p1 = scmp.lt.s32.totalorder %s1393_s17, %s2522_s1 }
  0x1b   : > { %p1395_p5 = scmp.ne.s32.totalorder %s1393_s17, %s1394_s19  ;;  %p1401_p2 = scmp.lt.s32.totalorder %s1399_s26, %s1394_s19 }
  0x1d   : > { %p1397_p9 = pnand %p1396_p8, %p1395_p5  ;;  %p1402_p7 = por %p1401_p2, %p1400_p1 }
  0x1f   : > { %p1398_p10 = pneg %p1397_p9 }
  0x21   : > { %p1403_p0 = pnand %p1402_p7, %p1398_p10 }
  0x23   : > { %1406 = shalt.err (!%p1403_p0)
}
  0x24   : > { %s1495_s27 = smov 512   ;;  %s1496_s3 = smov 32  }
  0x25   : > { %1187 = dma.hbm_to_vmem [thread:$0]  (!%p1590_p3), %s132_s14, 4608, %s134_s5, %s121_s16, %s1495_s27, %s1495_s27, %s1496_s3  }
  0x26   : > { %145 = sbr.rel (%p1574_p13) target bundleno = 240 (0xf0), region = 28 }
  0x2b   : > { %1467 = dma.done.wait (%p61_p4), [#allocation5], 16  }
  0x2c   : > { %1469 = vsyncadd (%p61_p4), [#allocation5], 4294967280  ;;  %s1615_s4 = sand.u32 1, %s1484_s10  }
  0x2d   : > { %s1171_s6 = smul.u32 288, %s1615_s4  ;;  %s153_s7 = scalar_lea.sflag [#allocation3], %s1615_s4 }
  0x2f   : > { %s1621_s28 = scalar_lea.vmem [#allocation6], %s1171_s6 }
  0x30   : > { %1471 = dma.done.wait (%p1559_p6), %s153_s7, 4608  }
  0x31   : > { %1473 = vsyncadd (%p1559_p6), %s153_s7, 4294962688 }
  0x32   : > { %162 = sfence }
  0x33   : > { %s217_s23 = sld [smem:[#allocation2]]  ;;  %v181_v0 = vld [vmem:[%s1621_s28] sm:$0xff]  ;;  %v182_v1 = vld [vmem:[%s1621_s28 + $0x8] sm:$0xff]  ;;  %v183_v2 = vld [vmem:[%s1621_s28 + $0x10] sm:$0xff]  ;;  %s1784_s20 = scalar_lea.vmem [#allocation7], %s1171_s6 }
  0x34   : > { %s1123_s5 = sld [smem:[#allocation2 + $0x1]]  ;;  %v184_v3 = vld [vmem:[%s1621_s28 + $0x18] sm:$0xff]  ;;  %v185_v4 = vld [vmem:[%s1621_s28 + $0x20] sm:$0xff]  ;;  %v186_v5 = vld [vmem:[%s1621_s28 + $0x28] sm:$0xff]  ;;  %s1169_s8 = smul.u32 288, %s1535_s13 }
  0x35   : > { %v187_v6 = vld [vmem:[%s1621_s28 + $0x30] sm:$0xff]  ;;  %v188_v8 = vld [vmem:[%s1621_s28 + $0x38] sm:$0xff]  ;;  %v189_v24 = vld [vmem:[%s1621_s28 + $0x40] sm:$0xff]  ;;  %s1027_s17 = sshll.u32 %s1784_s20, 4  ;;  %s1014_s24 = scalar_lea.sflag [#allocation4], %s1615_s4  ;;  %s1028_s17 = int_to_ptr.vmem [resolvable:$true] %s1027_s17 }
  0x36   : > { %v190_v25 = vld [vmem:[%s1621_s28 + $0x48] sm:$0xff]  ;;  %v191_v26 = vld [vmem:[%s1621_s28 + $0x50] sm:$0xff]  ;;  %v192_v36 = vld [vmem:[%s1621_s28 + $0x58] sm:$0xff]  ;;  %s1026_s16 = scalar_lea.hbm %s2523_s2, %s1169_s8  ;;  %s1442_s27 = scalar_lea.hbm %s2523_s2, 576 }
  0x37   : > { %v193_v37 = vld [vmem:[%s1621_s28 + $0x60] sm:$0xff]  ;;  %v194_v42 = vld [vmem:[%s1621_s28 + $0x68] sm:$0xff]  ;;  %v195_v62 = vld [vmem:[%s1621_s28 + $0x70] sm:$0xff]  ;;  %s1029_s19 = sshll.u32 %s1026_s16, 4  ;;  %s1030_s19 = int_to_ptr.hbm [resolvable:$true] %s1029_s19 }
  0x38   : > { %s1436_s25 = sshra.s32 %s1030_s19, 4  ;;  %s1437_s25 = int_to_ptr.hbm [resolvable:$true] %s1436_s25 }
  0x39   : > { %v1634_v7 = vstv %s217_s23  ;;  %s1438_s26 = scalar_lea.hbm %s1437_s25, 288  ;;  %p1443_p0 = scmp.lt.s32.totalorder %s1437_s25, %s2523_s2 }
  0x3a   : > { %v219_v9 = vmul.f32 %v1634_v7, %v181_v0  ;;  %v1638_v10 = vstv %s1123_s5  ;;  %v220_v11 = vmul.f32 %v1634_v7, %v182_v1  ;;  %v221_v12 = vmul.f32 %v1634_v7, %v183_v2  ;;  %p1439_p4 = scmp.ne.s32.totalorder %s1437_s25, %s1438_s26  ;;  %p1444_p3 = scmp.lt.s32.totalorder %s1442_s27, %s1438_s26 }
  0x3b   : > { %v222_v13 = vmul.f32 %v1634_v7, %v184_v3  ;;  %v223_v14 = vmul.f32 %v1634_v7, %v185_v4  ;;  %v224_v15 = vmul.f32 %v1634_v7, %v186_v5  ;;  %v225_v16 = vmul.f32 %v1634_v7, %v187_v6 }
  0x3c   : > { %v257_v17 = vadd.f32 %v1638_v10, %v219_v9  ;;  %v258_v18 = vadd.f32 %v1638_v10, %v220_v11  ;;  %v259_v19 = vadd.f32 %v1638_v10, %v221_v12  ;;  %v226_v20 = vmul.f32 %v1634_v7, %v188_v8  ;;  %p1440_p6 = pnand %p1439_p4, %p1566_p11  ;;  %p1445_p5 = por %p1444_p3, %p1443_p0 }
  0x3d   : > { %v260_v21 = vadd.f32 %v1638_v10, %v222_v13  ;;  %v261_v22 = vadd.f32 %v1638_v10, %v223_v14  ;;  %v262_v23 = vadd.f32 %v1638_v10, %v224_v15  ;;  %v263_v31 = vadd.f32 %v1638_v10, %v225_v16 }
  0x3e   : > { %v1124_v27 = vmul.f32 -1.442695, %v257_v17  ;;  %v1125_v28 = vmul.f32 -1.442695, %v258_v18  ;;  %v1126_v29 = vmul.f32 -1.442695, %v259_v19  ;;  %v264_v32 = vadd.f32 %v1638_v10, %v226_v20  ;;  %p1441_p13 = pneg %p1440_p6 }
  0x3f   : > { %v1127_v30 = vmul.f32 -1.442695, %v260_v21  ;;  %v1128_v33 = vmul.f32 -1.442695, %v261_v22  ;;  %v227_v34 = vmul.f32 %v1634_v7, %v189_v24  ;;  %v228_v35 = vmul.f32 %v1634_v7, %v190_v25 }
  0x40   : > { %1233 = vpow2.f32 %v1124_v27  ;;  %v1129_v38 = vmul.f32 -1.442695, %v262_v23  ;;  %v229_v39 = vmul.f32 %v1634_v7, %v191_v26  ;;  %v230_v40 = vmul.f32 %v1634_v7, %v192_v36  ;;  %p1446_p8 = pnand %p1445_p5, %p1441_p13 }
  0x41   : > { %1235 = vpow2.f32 %v1125_v28  ;;  %v231_v41 = vmul.f32 %v1634_v7, %v193_v37  ;;  %v1130_v43 = vmul.f32 -1.442695, %v263_v31  ;;  %v1131_v44 = vmul.f32 -1.442695, %v264_v32 }
  0x42   : > { %1237 = vpow2.f32 %v1126_v29  ;;  %v265_v45 = vadd.f32 %v1638_v10, %v227_v34  ;;  %v266_v46 = vadd.f32 %v1638_v10, %v228_v35  ;;  %v267_v47 = vadd.f32 %v1638_v10, %v229_v39 }
  0x43   : > { %1239 = vpow2.f32 %v1127_v30  ;;  %v232_v48 = vmul.f32 %v1634_v7, %v194_v42  ;;  %v268_v50 = vadd.f32 %v1638_v10, %v230_v40  ;;  %v269_v51 = vadd.f32 %v1638_v10, %v231_v41 }
  0x44   : > { %1241 = vpow2.f32 %v1128_v33  ;;  %v1132_v56 = vmul.f32 -1.442695, %v265_v45  ;;  %v1676_v57 = vmul.f32 -1.442695, %v266_v46  ;;  %v1680_v60 = vmul.f32 -1.442695, %v267_v47 }
  0x45   : > { %1243 = vpow2.f32 %v1129_v38  ;;  %v1683_v61 = vadd.f32 %v1638_v10, %v232_v48  ;;  %v1688_v1 = vmul.f32 -1.442695, %v268_v50  ;;  %v1690_v2 = vmul.f32 -1.442695, %v269_v51 }
  0x46   : > { %v1234_v49 = vpop.eup %1233  ;;  %1245 = vpow2.f32 %v1130_v43  ;;  %v1702_v11 = vmul.f32 %v1634_v7, %v195_v62 }
  0x47   : > { %v1236_v52 = vpop.eup %1235  ;;  %v1672_v53 = vadd.f32 1.0, %v1234_v49  ;;  %1247 = vpow2.f32 %v1131_v44  ;;  %v197_v44 = vld [vmem:[%s1621_s28 + $0x80] sm:$0xff] }
  0x48   : > { %v1238_v54 = vpop.eup %1237  ;;  %v1674_v55 = vadd.f32 1.0, %v1236_v52 }
  0x49   : > { %v1240_v58 = vpop.eup %1239  ;;  %1249 = vrcp.f32 %v1672_v53  ;;  %v448_v59 = vand.u32 2147483648, %v1672_v53  ;;  %v446_v0 = vand.u32 2147483647, %v1672_v53  ;;  %v1694_v6 = vadd.f32 1.0, %v1238_v54 }
  0x4a   : > { %v1242_v63 = vpop.eup %1241  ;;  %1251 = vrcp.f32 %v1674_v55  ;;  %v461_v4 = vand.u32 2147483647, %v1674_v55  ;;  %v463_v5 = vand.u32 2147483648, %v1674_v55  ;;  %v1696_v8 = vadd.f32 1.0, %v1240_v58 }
  0x4b   : > { %v1244_v3 = vpop.eup %1243  ;;  %vm442_vm0 = vweird.f32 %v1672_v53  ;;  %v1699_v9 = vadd.f32 1.0, %v1242_v63  ;;  %1253 = vpow2.f32 %v1132_v56  ;;  %v449_v13 = vor.u32 1.1754944e-38, %v448_v59 }
  0x4c   : > { %v1246_v12 = vpop.eup %1245  ;;  %vm457_vm1 = vweird.f32 %v1674_v55  ;;  %1255 = vrcp.f32 %v1694_v6  ;;  %v478_v14 = vand.u32 2147483648, %v1694_v6  ;;  %vm1707_vm2 = vcmp.eq.f32.partialorder %v446_v0, 8.507059e+37 }
  0x4d   : > { %v1248_v15 = vpop.eup %1247  ;;  %v476_v17 = vand.u32 2147483647, %v1694_v6  ;;  %1257 = vrcp.f32 %v1696_v8  ;;  %v493_v18 = vand.u32 2147483648, %v1696_v8  ;;  %v1714_v19 = vadd.f32 1.0, %v1244_v3 }
  0x4e   : > { %vm1716_vm3 = vcmp.eq.f32.partialorder %v461_v4, 8.507059e+37  ;;  %v464_v22 = vor.u32 1.1754944e-38, %v463_v5  ;;  %v491_v23 = vand.u32 2147483647, %v1696_v8  ;;  %1259 = vrcp.f32 %v1699_v9 }
  0x4f   : > { %v1250_v20 = vpop.eup %1249  ;;  %vm472_vm4 = vweird.f32 %v1694_v6  ;;  %v1724_v26 = vor.u32 1.1754944e-38, %v478_v14  ;;  %vm487_vm5 = vweird.f32 %v1696_v8  ;;  %vm502_vm6 = vweird.f32 %v1699_v9 }
  0x50   : > { %v1252_v24 = vpop.eup %1251  ;;  %v438_v25 = vmul.f32 %v1250_v20, %v1672_v53  ;;  %v506_v28 = vand.u32 2147483647, %v1699_v9  ;;  %v508_v29 = vand.u32 2147483648, %v1699_v9  ;;  %vm443_vm7 = vweird.f32 %v1250_v20 }
  0x51   : > { %v453_v27 = vmul.f32 %v1252_v24, %v1674_v55  ;;  %v1254_v30 = vpop.eup %1253  ;;  %vm1731_vm8 = vcmp.eq.f32.partialorder %v476_v17, 8.507059e+37  ;;  %v494_v33 = vor.u32 1.1754944e-38, %v493_v18  ;;  %1261 = vrcp.f32 %v1714_v19  ;;  %vm1750_vm13 = vmor %vm442_vm0, %vm443_vm7 }
  0x52   : > { %v439_v31 = vsub.f32 1.0, %v438_v25  ;;  %v1256_v34 = vpop.eup %1255  ;;  %vm458_vm9 = vweird.f32 %v1252_v24  ;;  %vm1736_vm10 = vcmp.eq.f32.partialorder %v491_v23, 8.507059e+37  ;;  %v521_v37 = vand.u32 2147483647, %v1714_v19 }
  0x53   : > { %v454_v35 = vsub.f32 1.0, %v453_v27  ;;  %v1258_v38 = vpop.eup %1257  ;;  %v468_v40 = vmul.f32 %v1256_v34, %v1694_v6  ;;  %vm1743_vm12 = vcmp.eq.f32.partialorder %v506_v28, 8.507059e+37  ;;  %v509_v42 = vor.u32 1.1754944e-38, %v508_v29  ;;  %vm1759_vm15 = vmor %vm457_vm1, %vm458_vm9 }
  0x54   : > { %v440_v39 = vmul.f32 %v1250_v20, %v439_v31  ;;  %v1260_v43 = vpop.eup %1259  ;;  %vm473_vm14 = vweird.f32 %v1256_v34  ;;  %v483_v46 = vmul.f32 %v1258_v38, %v1696_v8  ;;  %v523_v47 = vand.u32 2147483648, %v1714_v19 }
  0x55   : > { %v455_v45 = vmul.f32 %v1252_v24, %v454_v35  ;;  %v469_v50 = vsub.f32 1.0, %v468_v40  ;;  %vm488_vm11 = vweird.f32 %v1258_v38  ;;  %v498_v51 = vmul.f32 %v1260_v43, %v1699_v9  ;;  %vm1777_vm1 = vmor %vm472_vm4, %vm473_vm14  ;;  %v196_v40 = vld [vmem:[%s1621_s28 + $0x78] sm:$0xff] }
  0x56   : > { %v441_v48 = vadd.f32 %v1250_v20, %v440_v39  ;;  %v484_v53 = vsub.f32 1.0, %v483_v46  ;;  %vm503_vm0 = vweird.f32 %v1260_v43  ;;  %v1764_v54 = vadd.f32 1.0, %v1246_v12 }
  0x57   : > { %v456_v52 = vadd.f32 %v1252_v24, %v455_v45  ;;  %v1262_v56 = vpop.eup %1261  ;;  %v470_v59 = vmul.f32 %v1256_v34, %v469_v50  ;;  %v499_v55 = vsub.f32 1.0, %v498_v51  ;;  %v1768_v62 = vadd.f32 1.0, %v1248_v15  ;;  %vm1802_vm4 = vmor %vm502_vm6, %vm503_vm0  ;;  %v198_v51 = vld [vmem:[%s1621_s28 + $0x88] sm:$0xff] }
  0x58   : > { %v445_v58 = vsel %vm1750_vm13, %v1250_v20, %v441_v48  ;;  %v485_v4 = vmul.f32 %v1258_v38, %v484_v53  ;;  %v513_v5 = vmul.f32 %v1262_v56, %v1714_v19  ;;  %v1796_v15 = vadd.f32 1.0, %v1254_v30 }
  0x59   : > { %v450_v63 = vsel %vm1707_vm2, %v449_v13, %v445_v58  ;;  %v460_v0 = vsel %vm1759_vm15, %v1252_v24, %v456_v52  ;;  %v471_v13 = vadd.f32 %v1256_v34, %v470_v59  ;;  %vm1792_vm2 = vmor %vm487_vm5, %vm488_vm11  ;;  %v500_v14 = vmul.f32 %v1260_v43, %v499_v55  ;;  %v199_v58 = vld [vmem:[%s1621_s28 + $0x90] sm:$0xff] }
  0x5a   : > { %977 = vst [vmem:[%s1784_s20] sm:$0xff] %v450_v63  ;;  %v465_v12 = vsel %vm1716_vm3, %v464_v22, %v460_v0  ;;  %v486_v16 = vadd.f32 %v1258_v38, %v485_v4  ;;  %v514_v18 = vsub.f32 1.0, %v513_v5  ;;  %vm518_vm3 = vweird.f32 %v1262_v56 }
  0x5b   : > { %978 = vst [vmem:[%s1784_s20 + $0x8] sm:$0xff] %v465_v12  ;;  %1263 = vrcp.f32 %v1764_v54  ;;  %v475_v8 = vsel %vm1777_vm1, %v1256_v34, %v471_v13  ;;  %v501_v20 = vadd.f32 %v1260_v43, %v500_v14  ;;  %v536_v21 = vand.u32 2147483647, %v1764_v54 }
  0x5c   : > { %v538_v22 = vand.u32 2147483648, %v1764_v54  ;;  %v480_v9 = vsel %vm1731_vm8, %v1724_v26, %v475_v8  ;;  %v490_v23 = vsel %vm1792_vm2, %v1258_v38, %v486_v16  ;;  %v515_v24 = vmul.f32 %v1262_v56, %v514_v18 }
  0x5d   : > { %1265 = vrcp.f32 %v1768_v62  ;;  %979 = vst [vmem:[%s1784_s20 + $0x10] sm:$0xff] %v480_v9  ;;  %v495_v25 = vsel %vm1736_vm10, %v494_v33, %v490_v23  ;;  %v505_v27 = vsel %vm1802_vm4, %v1260_v43, %v501_v20  ;;  %vm2550_vm5 = vweird.f32 %v1714_v19 }
  0x5e   : > { %vm1824_vm6 = vmor %vm2550_vm5, %vm518_vm3  ;;  %v524_v26 = vor.u32 1.1754944e-38, %v523_v47  ;;  %v1137_v29 = vmul.f32 -1.442695, %v1683_v61  ;;  %980 = vst [vmem:[%s1784_s20 + $0x18] sm:$0xff] %v495_v25  ;;  %v510_v30 = vsel %vm1743_vm12, %v509_v42, %v505_v27  ;;  %v516_v31 = vadd.f32 %v1262_v56, %v515_v24 }
  0x5f   : > { %vm522_vm7 = vcmp.eq.f32.partialorder %v521_v37, 8.507059e+37  ;;  %v551_v32 = vand.u32 2147483647, %v1768_v62  ;;  %981 = vst [vmem:[%s1784_s20 + $0x20] sm:$0xff] %v510_v30  ;;  %vm532_vm8 = vweird.f32 %v1764_v54  ;;  %vm1835_vm9 = vcmp.eq.f32.partialorder %v536_v21, 8.507059e+37 }
  0x60   : > { %1267 = vrcp.f32 %v1796_v15  ;;  %v271_v61 = vadd.f32 %v1638_v10, %v1702_v11  ;;  %v520_v34 = vsel %vm1824_vm6, %v1262_v56, %v516_v31  ;;  %v539_v35 = vor.u32 1.1754944e-38, %v538_v22 }
  0x61   : > { %v1264_v33 = vpop.eup %1263  ;;  %v553_v36 = vand.u32 2147483648, %v1768_v62  ;;  %1269 = vpow2.f32 %v1676_v57  ;;  %v525_v37 = vsel %vm522_vm7, %v524_v26, %v520_v34  ;;  %vm547_vm10 = vweird.f32 %v1768_v62 }
  0x62   : > { %v528_v38 = vmul.f32 %v1264_v33, %v1764_v54  ;;  %v566_v39 = vand.u32 2147483647, %v1796_v15  ;;  %982 = vst [vmem:[%s1784_s20 + $0x28] sm:$0xff] %v525_v37  ;;  %vm1851_vm11 = vcmp.eq.f32.partialorder %v551_v32, 8.507059e+37  ;;  %vm562_vm12 = vweird.f32 %v1796_v15 }
  0x63   : > { %v1266_v41 = vpop.eup %1265  ;;  %v568_v42 = vand.u32 2147483648, %v1796_v15  ;;  %1271 = vpow2.f32 %v1680_v60  ;;  %vm533_vm13 = vweird.f32 %v1264_v33  ;;  %v554_v45 = vor.u32 1.1754944e-38, %v553_v36 }
  0x64   : > { %v529_v57 = vsub.f32 1.0, %v528_v38  ;;  %v543_v43 = vmul.f32 %v1266_v41, %v1768_v62  ;;  %1273 = vpow2.f32 %v1688_v1  ;;  %v1138_v46 = vmul.f32 -1.442695, %v271_v61  ;;  %vm1871_vm0 = vmor %vm532_vm8, %vm533_vm13 }
  0x65   : > { %1275 = vpow2.f32 %v1690_v2  ;;  %v234_v47 = vmul.f32 %v1634_v7, %v196_v40  ;;  %vm548_vm14 = vweird.f32 %v1266_v41  ;;  %vm1863_vm15 = vcmp.eq.f32.partialorder %v566_v39, 8.507059e+37 }
  0x66   : > { %v1268_v48 = vpop.eup %1267  ;;  %v530_v49 = vmul.f32 %v1264_v33, %v529_v57  ;;  %v544_v50 = vsub.f32 1.0, %v543_v43  ;;  %v569_v53 = vor.u32 1.1754944e-38, %v568_v42  ;;  %1277 = vpow2.f32 %v1137_v29  ;;  %vm1884_vm1 = vmor %vm547_vm10, %vm548_vm14 }
  0x67   : > { %v1270_v52 = vpop.eup %1269  ;;  %v558_v2 = vmul.f32 %v1268_v48, %v1796_v15  ;;  %v235_v56 = vmul.f32 %v1634_v7, %v197_v44  ;;  %v272_v0 = vadd.f32 %v1638_v10, %v234_v47  ;;  %vm563_vm2 = vweird.f32 %v1268_v48 }
  0x68   : > { %v531_v59 = vadd.f32 %v1264_v33, %v530_v49  ;;  %v545_v55 = vmul.f32 %v1266_v41, %v544_v50  ;;  %v1878_v63 = vadd.f32 1.0, %v1270_v52  ;;  %1279 = vpow2.f32 %v1138_v46  ;;  %vm1903_vm4 = vmor %vm562_vm12, %vm563_vm2  ;;  %v202_v50 = vld [vmem:[%s1621_s28 + $0xa8] sm:$0xff] }
  0x69   : > { %v1272_v3 = vpop.eup %1271  ;;  %v559_v4 = vsub.f32 1.0, %v558_v2  ;;  %v236_v5 = vmul.f32 %v1634_v7, %v198_v51  ;;  %v237_v14 = vmul.f32 %v1634_v7, %v199_v58  ;;  %v273_v8 = vadd.f32 %v1638_v10, %v235_v56 }
  0x6a   : > { %v1274_v12 = vpop.eup %1273  ;;  %v535_v13 = vsel %vm1871_vm0, %v1264_v33, %v531_v59  ;;  %v546_v6 = vadd.f32 %v1266_v41, %v545_v55  ;;  %1281 = vrcp.f32 %v1878_v63  ;;  %v581_v18 = vand.u32 2147483647, %v1878_v63 }
  0x6b   : > { %v1276_v62 = vpop.eup %1275  ;;  %v540_v16 = vsel %vm1835_vm9, %v539_v35, %v535_v13  ;;  %v560_v17 = vmul.f32 %v1268_v48, %v559_v4  ;;  %v1907_v22 = vadd.f32 1.0, %v1272_v3  ;;  %v1909_v9 = vadd.f32 1.0, %v1274_v12 }
  0x6c   : > { %983 = vst [vmem:[%s1784_s20 + $0x30] sm:$0xff] %v540_v16  ;;  %v550_v20 = vsel %vm1884_vm1, %v1266_v41, %v546_v6  ;;  %v1139_v23 = vmul.f32 -1.442695, %v272_v0  ;;  %v1278_v24 = vpop.eup %1277  ;;  %v583_v28 = vand.u32 2147483648, %v1878_v63  ;;  %v1914_v26 = vadd.f32 1.0, %v1276_v62 }
  0x6d   : > { %v555_v25 = vsel %vm1851_vm11, %v554_v45, %v550_v20  ;;  %v561_v27 = vadd.f32 %v1268_v48, %v560_v17  ;;  %vm577_vm3 = vweird.f32 %v1878_v63  ;;  %1283 = vrcp.f32 %v1907_v22 }
  0x6e   : > { %984 = vst [vmem:[%s1784_s20 + $0x38] sm:$0xff] %v555_v25  ;;  %v274_v15 = vadd.f32 %v1638_v10, %v236_v5  ;;  %v1921_v29 = vadd.f32 %v1638_v10, %v237_v14  ;;  %v1280_v30 = vpop.eup %1279  ;;  %vm1925_vm5 = vcmp.eq.f32.partialorder %v581_v18, 8.507059e+37  ;;  %v596_v19 = vand.u32 2147483647, %v1907_v22 }
  0x6f   : > { %v565_v31 = vsel %vm1903_vm4, %v1268_v48, %v561_v27  ;;  %1285 = vrcp.f32 %v1909_v9  ;;  %v598_v34 = vand.u32 2147483648, %v1907_v22  ;;  %v611_v35 = vand.u32 2147483647, %v1909_v9 }
  0x70   : > { %v1282_v61 = vpop.eup %1281  ;;  %v570_v33 = vsel %vm1863_vm15, %v569_v53, %v565_v31  ;;  %v613_v36 = vand.u32 2147483648, %v1909_v9  ;;  %v584_v38 = vor.u32 1.1754944e-38, %v583_v28  ;;  %vm592_vm6 = vweird.f32 %v1907_v22 }
  0x71   : > { %985 = vst [vmem:[%s1784_s20 + $0x40] sm:$0xff] %v570_v33  ;;  %v573_v37 = vmul.f32 %v1282_v61, %v1878_v63  ;;  %1287 = vrcp.f32 %v1914_v26  ;;  %vm578_vm7 = vweird.f32 %v1282_v61  ;;  %vm607_vm8 = vweird.f32 %v1909_v9  ;;  %v200_v33 = vld [vmem:[%s1621_s28 + $0x98] sm:$0xff] }
  0x72   : > { %v626_v39 = vand.u32 2147483647, %v1914_v26  ;;  %v628_v40 = vand.u32 2147483648, %v1914_v26  ;;  %v1943_v11 = vadd.f32 1.0, %v1278_v24  ;;  %v1945_v42 = vadd.f32 1.0, %v1280_v30  ;;  %vm1961_vm12 = vmor %vm577_vm3, %vm578_vm7 }
  0x73   : > { %v574_v41 = vsub.f32 1.0, %v573_v37  ;;  %1289 = vpow2.f32 %v1139_v23  ;;  %v1284_v57 = vpop.eup %1283  ;;  %vm1947_vm9 = vcmp.eq.f32.partialorder %v596_v19, 8.507059e+37  ;;  %v599_v44 = vor.u32 1.1754944e-38, %v598_v34  ;;  %v201_v34 = vld [vmem:[%s1621_s28 + $0xa0] sm:$0xff] }
  0x74   : > { %vm1951_vm10 = vcmp.eq.f32.partialorder %v611_v35, 8.507059e+37  ;;  %v614_v46 = vor.u32 1.1754944e-38, %v613_v36  ;;  %v588_v49 = vmul.f32 %v1284_v57, %v1907_v22  ;;  %vm622_vm11 = vweird.f32 %v1914_v26 }
  0x75   : > { %v1286_v47 = vpop.eup %1285  ;;  %v575_v48 = vmul.f32 %v1282_v61, %v574_v41  ;;  %1291 = vrcp.f32 %v1943_v11  ;;  %vm1966_vm13 = vcmp.eq.f32.partialorder %v626_v39, 8.507059e+37  ;;  %v629_v52 = vor.u32 1.1754944e-38, %v628_v40 }
  0x76   : > { %v603_v60 = vmul.f32 %v1286_v47, %v1909_v9  ;;  %v1140_v1 = vmul.f32 -1.442695, %v273_v8  ;;  %v589_v56 = vsub.f32 1.0, %v588_v49  ;;  %vm593_vm14 = vweird.f32 %v1284_v57 }
  0x77   : > { %v1288_v2 = vpop.eup %1287  ;;  %v576_v53 = vadd.f32 %v1282_v61, %v575_v48  ;;  %1293 = vrcp.f32 %v1945_v42  ;;  %vm608_vm15 = vweird.f32 %v1286_v47  ;;  %v641_v55 = vand.u32 2147483647, %v1943_v11  ;;  %vm1980_vm1 = vmor %vm592_vm6, %vm593_vm14 }
  0x78   : > { %v604_v58 = vsub.f32 1.0, %v603_v60  ;;  %v618_v59 = vmul.f32 %v1288_v2, %v1914_v26  ;;  %v590_v3 = vmul.f32 %v1284_v57, %v589_v56  ;;  %vm637_vm0 = vweird.f32 %v1943_v11  ;;  %vm1988_vm4 = vmor %vm607_vm8, %vm608_vm15  ;;  %v203_v60 = vld [vmem:[%s1621_s28 + $0xb0] sm:$0xff] }
  0x79   : > { %v1290_v63 = vpop.eup %1289  ;;  %v580_v0 = vsel %vm1961_vm12, %v1282_v61, %v576_v53  ;;  %v1141_v54 = vmul.f32 -1.442695, %v274_v15  ;;  %vm623_vm2 = vweird.f32 %v1288_v2  ;;  %v643_v16 = vand.u32 2147483648, %v1943_v11 }
  0x7a   : > { %v585_v4 = vsel %vm1925_vm5, %v584_v38, %v580_v0  ;;  %v605_v12 = vmul.f32 %v1286_v47, %v604_v58  ;;  %v619_v13 = vsub.f32 1.0, %v618_v59  ;;  %v591_v14 = vadd.f32 %v1284_v57, %v590_v3  ;;  %vm2004_vm5 = vmor %vm622_vm11, %vm623_vm2 }
  0x7b   : > { %v1292_v6 = vpop.eup %1291  ;;  %986 = vst [vmem:[%s1784_s20 + $0x48] sm:$0xff] %v585_v4  ;;  %v1993_v17 = vadd.f32 1.0, %v1290_v63  ;;  %1295 = vpow2.f32 %v1140_v1  ;;  %vm1996_vm3 = vcmp.eq.f32.partialorder %v641_v55, 8.507059e+37  ;;  %v658_v24 = vand.u32 2147483648, %v1945_v42 }
  0x7c   : > { %v606_v18 = vadd.f32 %v1286_v47, %v605_v12  ;;  %v620_v8 = vmul.f32 %v1288_v2, %v619_v13  ;;  %v633_v20 = vmul.f32 %v1292_v6, %v1943_v11  ;;  %v595_v9 = vsel %vm1980_vm1, %v1284_v57, %v591_v14 }
  0x7d   : > { %v1294_v22 = vpop.eup %1293  ;;  %vm638_vm6 = vweird.f32 %v1292_v6  ;;  %1297 = vrcp.f32 %v1993_v17  ;;  %v600_v25 = vsel %vm1947_vm9, %v599_v44, %v595_v9  ;;  %v644_v30 = vor.u32 1.1754944e-38, %v643_v16 }
  0x7e   : > { %v610_v27 = vsel %vm1988_vm4, %v1286_v47, %v606_v18  ;;  %v621_v28 = vadd.f32 %v1288_v2, %v620_v8  ;;  %v634_v15 = vsub.f32 1.0, %v633_v20  ;;  %987 = vst [vmem:[%s1784_s20 + $0x50] sm:$0xff] %v600_v25  ;;  %v648_v31 = vmul.f32 %v1294_v22, %v1945_v42  ;;  %vm2030_vm9 = vmor %vm637_vm0, %vm638_vm6 }
  0x7f   : > { %v615_v26 = vsel %vm1951_vm10, %v614_v46, %v610_v27  ;;  %vm652_vm7 = vweird.f32 %v1945_v42  ;;  %vm653_vm8 = vweird.f32 %v1294_v22  ;;  %v656_v61 = vand.u32 2147483647, %v1945_v42 }
  0x80   : > { %988 = vst [vmem:[%s1784_s20 + $0x58] sm:$0xff] %v615_v26  ;;  %v625_v32 = vsel %vm2004_vm5, %v1288_v2, %v621_v28  ;;  %v635_v19 = vmul.f32 %v1292_v6, %v634_v15  ;;  %v649_v38 = vsub.f32 1.0, %v648_v31  ;;  %1299 = vpow2.f32 %v1141_v54  ;;  %vm2046_vm10 = vmor %vm652_vm7, %vm653_vm8 }
  0x81   : > { %v1296_v35 = vpop.eup %1295  ;;  %v630_v36 = vsel %vm1966_vm13, %v629_v52, %v625_v32  ;;  %v1142_v39 = vmul.f32 -1.442695, %v1921_v29  ;;  %v659_v41 = vor.u32 1.1754944e-38, %v658_v24  ;;  %v671_v57 = vand.u32 2147483647, %v1993_v17  ;;  %v204_v24 = vld [vmem:[%s1621_s28 + $0xb8] sm:$0xff] }
  0x82   : > { %989 = vst [vmem:[%s1784_s20 + $0x60] sm:$0xff] %v630_v36  ;;  %v636_v40 = vadd.f32 %v1292_v6, %v635_v19  ;;  %v2037_v43 = vadd.f32 1.0, %v1296_v35  ;;  %v650_v11 = vmul.f32 %v1294_v22, %v649_v38  ;;  %v238_v45 = vmul.f32 %v1634_v7, %v200_v33 }
  0x83   : > { %v1298_v44 = vpop.eup %1297  ;;  %1301 = vpow2.f32 %v1142_v39  ;;  %v239_v46 = vmul.f32 %v1634_v7, %v201_v34  ;;  %v673_v49 = vand.u32 2147483648, %v1993_v17  ;;  %vm657_vm11 = vcmp.eq.f32.partialorder %v656_v61, 8.507059e+37  ;;  %v206_v61 = vld [vmem:[%s1621_s28 + $0xc8] sm:$0xff] }
  0x84   : > { %v640_v29 = vsel %vm2030_vm9, %v1292_v6, %v636_v40  ;;  %v663_v48 = vmul.f32 %v1298_v44, %v1993_v17  ;;  %1303 = vrcp.f32 %v2037_v43  ;;  %v651_v52 = vadd.f32 %v1294_v22, %v650_v11 }
  0x85   : > { %v645_v51 = vsel %vm1996_vm3, %v644_v30, %v640_v29  ;;  %vm667_vm12 = vweird.f32 %v1993_v17  ;;  %vm668_vm13 = vweird.f32 %v1298_v44  ;;  %v276_v1 = vadd.f32 %v1638_v10, %v238_v45  ;;  %v205_v30 = vld [vmem:[%s1621_s28 + $0xc0] sm:$0xff] }
  0x86   : > { %990 = vst [vmem:[%s1784_s20 + $0x68] sm:$0xff] %v645_v51  ;;  %v664_v42 = vsub.f32 1.0, %v663_v48  ;;  %v277_v2 = vadd.f32 %v1638_v10, %v239_v46  ;;  %v1300_v53 = vpop.eup %1299  ;;  %v655_v56 = vsel %vm2046_vm10, %v1294_v22, %v651_v52  ;;  %vm2063_vm14 = vcmp.eq.f32.partialorder %v671_v57, 8.507059e+37  ;;  %vm2074_vm15 = vmor %vm667_vm12, %vm668_vm13 }
  0x87   : > { %v240_v59 = vmul.f32 %v1634_v7, %v202_v50  ;;  %v241_v55 = vmul.f32 %v1634_v7, %v203_v60  ;;  %v660_v63 = vsel %vm657_vm11, %v659_v41, %v655_v56  ;;  %v674_v3 = vor.u32 1.1754944e-38, %v673_v49 }
  0x88   : > { %v665_v0 = vmul.f32 %v1298_v44, %v664_v42  ;;  %v2069_v54 = vadd.f32 1.0, %v1300_v53  ;;  %991 = vst [vmem:[%s1784_s20 + $0x70] sm:$0xff] %v660_v63  ;;  %vm682_vm0 = vweird.f32 %v2037_v43  ;;  %v686_v12 = vand.u32 2147483647, %v2037_v43 }
  0x89   : > { %v1302_v4 = vpop.eup %1301  ;;  %v1143_v13 = vmul.f32 -1.442695, %v276_v1  ;;  %v278_v6 = vadd.f32 %v1638_v10, %v240_v59  ;;  %v688_v16 = vand.u32 2147483648, %v2037_v43  ;;  %v1144_v17 = vmul.f32 -1.442695, %v277_v2  ;;  %v207_v1 = vld [vmem:[%s1621_s28 + $0xd0] sm:$0xff] }
  0x8a   : > { %v1304_v14 = vpop.eup %1303  ;;  %v666_v62 = vadd.f32 %v1298_v44, %v665_v0  ;;  %1305 = vrcp.f32 %v2069_v54  ;;  %v701_v8 = vand.u32 2147483647, %v2069_v54  ;;  %v2085_v20 = vadd.f32 1.0, %v1302_v4  ;;  %v208_v2 = vld [vmem:[%s1621_s28 + $0xd8] sm:$0xff] }
  0x8b   : > { %v678_v18 = vmul.f32 %v1304_v14, %v2037_v43  ;;  %v279_v21 = vadd.f32 %v1638_v10, %v241_v55  ;;  %v703_v9 = vand.u32 2147483648, %v2069_v54  ;;  %1307 = vpow2.f32 %v1143_v13 }
  0x8c   : > { %v670_v22 = vsel %vm2074_vm15, %v1298_v44, %v666_v62  ;;  %v1145_v23 = vmul.f32 -1.442695, %v278_v6  ;;  %vm683_vm1 = vweird.f32 %v1304_v14  ;;  %1309 = vrcp.f32 %v2085_v20 }
  0x8d   : > { %v675_v25 = vsel %vm2063_vm14, %v674_v3, %v670_v22  ;;  %v679_v27 = vsub.f32 1.0, %v678_v18  ;;  %vm2096_vm2 = vcmp.eq.f32.partialorder %v686_v12, 8.507059e+37  ;;  %v689_v15 = vor.u32 1.1754944e-38, %v688_v16  ;;  %vm2106_vm4 = vmor %vm682_vm0, %vm683_vm1 }
  0x8e   : > { %992 = vst [vmem:[%s1784_s20 + $0x78] sm:$0xff] %v675_v25  ;;  %v716_v26 = vand.u32 2147483647, %v2085_v20  ;;  %1311 = vpow2.f32 %v1144_v17  ;;  %v1146_v32 = vmul.f32 -1.442695, %v279_v21  ;;  %v242_v19 = vmul.f32 %v1634_v7, %v204_v24 }
  0x8f   : > { %v680_v31 = vmul.f32 %v1304_v14, %v679_v27  ;;  %1313 = vpow2.f32 %v1145_v23  ;;  %vm697_vm3 = vweird.f32 %v2069_v54  ;;  %vm2111_vm5 = vcmp.eq.f32.partialorder %v701_v8, 8.507059e+37 }
  0x90   : > { %v1306_v33 = vpop.eup %1305  ;;  %v704_v36 = vor.u32 1.1754944e-38, %v703_v9  ;;  %v718_v37 = vand.u32 2147483648, %v2085_v20  ;;  %vm712_vm6 = vweird.f32 %v2085_v20  ;;  %v243_v40 = vmul.f32 %v1634_v7, %v205_v30 }
  0x91   : > { %v681_v38 = vadd.f32 %v1304_v14, %v680_v31  ;;  %v693_v39 = vmul.f32 %v1306_v33, %v2069_v54  ;;  %v1308_v41 = vpop.eup %1307  ;;  %vm2119_vm7 = vcmp.eq.f32.partialorder %v716_v26, 8.507059e+37  ;;  %1315 = vpow2.f32 %v1146_v32 }
  0x92   : > { %v280_v43 = vadd.f32 %v1638_v10, %v242_v19  ;;  %v244_v44 = vmul.f32 %v1634_v7, %v206_v61  ;;  %v1310_v11 = vpop.eup %1309  ;;  %vm698_vm8 = vweird.f32 %v1306_v33  ;;  %v2127_v29 = vadd.f32 1.0, %v1308_v41 }
  0x93   : > { %v685_v45 = vsel %vm2106_vm4, %v1304_v14, %v681_v38  ;;  %v694_v46 = vsub.f32 1.0, %v693_v39  ;;  %v708_v49 = vmul.f32 %v1310_v11, %v2085_v20  ;;  %v719_v50 = vor.u32 1.1754944e-38, %v718_v37  ;;  %vm2140_vm10 = vmor %vm697_vm3, %vm698_vm8 }
  0x94   : > { %v1312_v47 = vpop.eup %1311  ;;  %v690_v48 = vsel %vm2096_vm2, %v689_v15, %v685_v45  ;;  %v1147_v60 = vmul.f32 -1.442695, %v280_v43  ;;  %vm713_vm9 = vweird.f32 %v1310_v11  ;;  %1317 = vrcp.f32 %v2127_v29 }
  0x95   : > { %v1314_v51 = vpop.eup %1313  ;;  %993 = vst [vmem:[%s1784_s20 + $0x80] sm:$0xff] %v690_v48  ;;  %v695_v52 = vmul.f32 %v1306_v33, %v694_v46  ;;  %v281_v42 = vadd.f32 %v1638_v10, %v243_v40  ;;  %v709_v56 = vsub.f32 1.0, %v708_v49  ;;  %v731_v58 = vand.u32 2147483647, %v2127_v29  ;;  %vm2161_vm11 = vmor %vm712_vm6, %vm713_vm9 }
  0x96   : > { %v2145_v59 = vadd.f32 1.0, %v1312_v47  ;;  %v2147_v55 = vadd.f32 1.0, %v1314_v51  ;;  %v733_v0 = vand.u32 2147483648, %v2127_v29  ;;  %1319 = vpow2.f32 %v1147_v60  ;;  %v209_v60 = vld [vmem:[%s1621_s28 + $0xe0] sm:$0xff]  ;;  %v210_v51 = vld [vmem:[%s1621_s28 + $0xe8] sm:$0xff] }
  0x97   : > { %v696_v63 = vadd.f32 %v1306_v33, %v695_v52  ;;  %v282_v3 = vadd.f32 %v1638_v10, %v244_v44  ;;  %v1316_v4 = vpop.eup %1315  ;;  %v710_v54 = vmul.f32 %v1310_v11, %v709_v56  ;;  %v245_v5 = vmul.f32 %v1634_v7, %v207_v1 }
  0x98   : > { %1321 = vrcp.f32 %v2145_v59  ;;  %v2154_v12 = vmul.f32 %v1634_v7, %v208_v2  ;;  %vm727_vm12 = vweird.f32 %v2127_v29  ;;  %v746_v14 = vand.u32 2147483647, %v2145_v59 }
  0x99   : > { %v700_v13 = vsel %vm2140_vm10, %v1306_v33, %v696_v63  ;;  %1323 = vrcp.f32 %v2147_v55  ;;  %v711_v16 = vadd.f32 %v1310_v11, %v710_v54  ;;  %vm2170_vm13 = vcmp.eq.f32.partialorder %v731_v58, 8.507059e+37 }
  0x9a   : > { %v705_v62 = vsel %vm2111_vm5, %v704_v36, %v700_v13  ;;  %v748_v18 = vand.u32 2147483648, %v2145_v59  ;;  %v1318_v8 = vpop.eup %1317  ;;  %v734_v20 = vor.u32 1.1754944e-38, %v733_v0  ;;  %vm742_vm14 = vweird.f32 %v2145_v59 }
  0x9b   : > { %994 = vst [vmem:[%s1784_s20 + $0x88] sm:$0xff] %v705_v62  ;;  %v2177_v21 = vadd.f32 1.0, %v1316_v4  ;;  %v1148_v22 = vmul.f32 -1.442695, %v281_v42  ;;  %v715_v9 = vsel %vm2161_vm11, %v1310_v11, %v711_v16  ;;  %v723_v23 = vmul.f32 %v1318_v8, %v2127_v29 }
  0x9c   : > { %vm757_vm15 = vweird.f32 %v2147_v55  ;;  %v761_v24 = vand.u32 2147483647, %v2147_v55  ;;  %v1320_v25 = vpop.eup %1319  ;;  %v720_v27 = vsel %vm2119_vm7, %v719_v50, %v715_v9  ;;  %vm2186_vm0 = vcmp.eq.f32.partialorder %v746_v14, 8.507059e+37 }
  0x9d   : > { %v763_v15 = vand.u32 2147483648, %v2147_v55  ;;  %1325 = vrcp.f32 %v2177_v21  ;;  %995 = vst [vmem:[%s1784_s20 + $0x90] sm:$0xff] %v720_v27  ;;  %v724_v30 = vsub.f32 1.0, %v723_v23  ;;  %vm728_vm1 = vweird.f32 %v1318_v8  ;;  %v212_v27 = vld [vmem:[%s1621_s28 + $0xf8] sm:$0xff] }
  0x9e   : > { %v1322_v26 = vpop.eup %1321  ;;  %v749_v31 = vor.u32 1.1754944e-38, %v748_v18  ;;  %v2193_v32 = vadd.f32 1.0, %v1320_v25  ;;  %v776_v33 = vand.u32 2147483647, %v2177_v21  ;;  %1327 = vpow2.f32 %v1148_v22  ;;  %vm2205_vm4 = vmor %vm727_vm12, %vm728_vm1  ;;  %v211_v25 = vld [vmem:[%s1621_s28 + $0xf0] sm:$0xff] }
  0x9f   : > { %v1324_v19 = vpop.eup %1323  ;;  %v738_v61 = vmul.f32 %v1322_v26, %v2145_v59  ;;  %v1149_v34 = vmul.f32 -1.442695, %v282_v3  ;;  %v725_v35 = vmul.f32 %v1318_v8, %v724_v30  ;;  %vm2198_vm2 = vcmp.eq.f32.partialorder %v761_v24, 8.507059e+37 }
  0xa0   : > { %v753_v36 = vmul.f32 %v1324_v19, %v2147_v55  ;;  %v778_v38 = vand.u32 2147483648, %v2177_v21  ;;  %vm743_vm3 = vweird.f32 %v1322_v26  ;;  %v764_v41 = vor.u32 1.1754944e-38, %v763_v15 }
  0xa1   : > { %v739_v40 = vsub.f32 1.0, %v738_v61  ;;  %1329 = vrcp.f32 %v2193_v32  ;;  %v726_v57 = vadd.f32 %v1318_v8, %v725_v35  ;;  %vm758_vm5 = vweird.f32 %v1324_v19  ;;  %vm2220_vm8 = vmor %vm742_vm14, %vm743_vm3 }
  0xa2   : > { %v754_v43 = vsub.f32 1.0, %v753_v36  ;;  %vm772_vm6 = vweird.f32 %v2177_v21  ;;  %vm2211_vm7 = vcmp.eq.f32.partialorder %v776_v33, 8.507059e+37  ;;  %1331 = vpow2.f32 %v1149_v34  ;;  %vm2232_vm9 = vmor %vm757_vm15, %vm758_vm5 }
  0xa3   : > { %v1326_v44 = vpop.eup %1325  ;;  %v740_v11 = vmul.f32 %v1322_v26, %v739_v40  ;;  %v283_v46 = vadd.f32 %v1638_v10, %v245_v5  ;;  %v730_v29 = vsel %vm2205_vm4, %v1318_v8, %v726_v57  ;;  %v779_v50 = vor.u32 1.1754944e-38, %v778_v38  ;;  %v213_v57 = vld [vmem:[%s1621_s28 + $0x100] sm:$0xff] }
  0xa4   : > { %v755_v48 = vmul.f32 %v1324_v19, %v754_v43  ;;  %v768_v49 = vmul.f32 %v1326_v44, %v2177_v21  ;;  %v1328_v52 = vpop.eup %1327  ;;  %v735_v42 = vsel %vm2170_vm13, %v734_v20, %v730_v29  ;;  %vm787_vm10 = vweird.f32 %v2193_v32 }
  0xa5   : > { %v741_v1 = vadd.f32 %v1322_v26, %v740_v11  ;;  %v284_v53 = vadd.f32 %v1638_v10, %v2154_v12  ;;  %996 = vst [vmem:[%s1784_s20 + $0x98] sm:$0xff] %v735_v42  ;;  %vm773_vm11 = vweird.f32 %v1326_v44  ;;  %v2240_v59 = vadd.f32 1.0, %v1328_v52 }
  0xa6   : > { %v756_v56 = vadd.f32 %v1324_v19, %v755_v48  ;;  %v769_v58 = vsub.f32 1.0, %v768_v49  ;;  %v1150_v0 = vmul.f32 -1.442695, %v283_v46  ;;  %v247_v3 = vmul.f32 %v1634_v7, %v209_v60  ;;  %vm2256_vm12 = vmor %vm772_vm6, %vm773_vm11 }
  0xa7   : > { %v1330_v63 = vpop.eup %1329  ;;  %v745_v55 = vsel %vm2220_vm8, %v1322_v26, %v741_v1  ;;  %v248_v4 = vmul.f32 %v1634_v7, %v210_v51  ;;  %v791_v16 = vand.u32 2147483647, %v2193_v32  ;;  %v793_v17 = vand.u32 2147483648, %v2193_v32 }
  0xa8   : > { %v750_v54 = vsel %vm2186_vm0, %v749_v31, %v745_v55  ;;  %v760_v5 = vsel %vm2232_vm9, %v1324_v19, %v756_v56  ;;  %v770_v12 = vmul.f32 %v1326_v44, %v769_v58  ;;  %v783_v13 = vmul.f32 %v1330_v63, %v2193_v32  ;;  %v1332_v6 = vpop.eup %1331  ;;  %v214_v55 = vld [vmem:[%s1621_s28 + $0x108] sm:$0xff] }
  0xa9   : > { %997 = vst [vmem:[%s1784_s20 + $0xa0] sm:$0xff] %v750_v54  ;;  %v765_v14 = vsel %vm2198_vm2, %v764_v41, %v760_v5  ;;  %1333 = vrcp.f32 %v2240_v59  ;;  %vm788_vm13 = vweird.f32 %v1330_v63  ;;  %v1151_v20 = vmul.f32 -1.442695, %v284_v53 }
  0xaa   : > { %998 = vst [vmem:[%s1784_s20 + $0xa8] sm:$0xff] %v765_v14  ;;  %v771_v18 = vadd.f32 %v1326_v44, %v770_v12  ;;  %v784_v8 = vsub.f32 1.0, %v783_v13  ;;  %v2264_v22 = vadd.f32 1.0, %v1332_v6  ;;  %1335 = vpow2.f32 %v1150_v0  ;;  %vm2276_vm14 = vmor %vm787_vm10, %vm788_vm13  ;;  %v215_v12 = vld [vmem:[%s1621_s28 + $0x110] sm:$0xff] }
  0xab   : > { %v285_v21 = vadd.f32 %v1638_v10, %v247_v3  ;;  %v286_v9 = vadd.f32 %v1638_v10, %v248_v4  ;;  %v794_v26 = vor.u32 1.1754944e-38, %v793_v17  ;;  %vm792_vm15 = vcmp.eq.f32.partialorder %v791_v16, 8.507059e+37 }
  0xac   : > { %v775_v23 = vsel %vm2256_vm12, %v1326_v44, %v771_v18  ;;  %v785_v24 = vmul.f32 %v1330_v63, %v784_v8  ;;  %1337 = vrcp.f32 %v2264_v22  ;;  %v806_v61 = vand.u32 2147483647, %v2240_v59 }
  0xad   : > { %v780_v28 = vsel %vm2211_vm7, %v779_v50, %v775_v23  ;;  %1339 = vpow2.f32 %v1151_v20  ;;  %v1152_v31 = vmul.f32 -1.442695, %v285_v21  ;;  %v1153_v33 = vmul.f32 -1.442695, %v286_v9 }
  0xae   : > { %999 = vst [vmem:[%s1784_s20 + $0xb0] sm:$0xff] %v780_v28  ;;  %v786_v30 = vadd.f32 %v1330_v63, %v785_v24  ;;  %v249_v32 = vmul.f32 %v1634_v7, %v211_v25  ;;  %v250_v34 = vmul.f32 %v1634_v7, %v212_v27  ;;  %vm802_vm0 = vweird.f32 %v2240_v59 }
  0xaf   : > { %v1334_v19 = vpop.eup %1333  ;;  %v808_v37 = vand.u32 2147483648, %v2240_v59  ;;  %1341 = vpow2.f32 %v1152_v31  ;;  %vm2296_vm2 = vcmp.eq.f32.partialorder %v806_v61, 8.507059e+37  ;;  %v821_v46 = vand.u32 2147483647, %v2264_v22 }
  0xb0   : > { %v790_v35 = vsel %vm2276_vm14, %v1330_v63, %v786_v30  ;;  %v798_v36 = vmul.f32 %v1334_v19, %v2240_v59  ;;  %v1336_v38 = vpop.eup %1335  ;;  %v287_v40 = vadd.f32 %v1638_v10, %v249_v32  ;;  %v288_v41 = vadd.f32 %v1638_v10, %v250_v34 }
  0xb1   : > { %v795_v39 = vsel %vm792_vm15, %v794_v26, %v790_v35  ;;  %vm803_vm1 = vweird.f32 %v1334_v19  ;;  %v2294_v44 = vadd.f32 1.0, %v1336_v38  ;;  %1343 = vpow2.f32 %v1153_v33 }
  0xb2   : > { %1000 = vst [vmem:[%s1784_s20 + $0xb8] sm:$0xff] %v795_v39  ;;  %v799_v43 = vsub.f32 1.0, %v798_v36  ;;  %v1338_v11 = vpop.eup %1337  ;;  %v823_v29 = vand.u32 2147483648, %v2264_v22  ;;  %v1154_v47 = vmul.f32 -1.442695, %v287_v40  ;;  %v251_v60 = vmul.f32 %v1634_v7, %v213_v57  ;;  %vm2307_vm4 = vmor %vm802_vm0, %vm803_vm1 }
  0xb3   : > { %v1340_v48 = vpop.eup %1339  ;;  %v813_v50 = vmul.f32 %v1338_v11, %v2264_v22  ;;  %1345 = vrcp.f32 %v2294_v44  ;;  %v809_v52 = vor.u32 1.1754944e-38, %v808_v37  ;;  %vm817_vm3 = vweird.f32 %v2264_v22 }
  0xb4   : > { %v800_v49 = vmul.f32 %v1334_v19, %v799_v43  ;;  %v2312_v42 = vadd.f32 1.0, %v1340_v48  ;;  %v1155_v1 = vmul.f32 -1.442695, %v288_v41  ;;  %vm818_vm5 = vweird.f32 %v1338_v11 }
  0xb5   : > { %v814_v53 = vsub.f32 1.0, %v813_v50  ;;  %1347 = vpow2.f32 %v1154_v47  ;;  %v1342_v56 = vpop.eup %1341  ;;  %vm2314_vm6 = vcmp.eq.f32.partialorder %v821_v46, 8.507059e+37  ;;  %v824_v59 = vor.u32 1.1754944e-38, %v823_v29  ;;  %vm2331_vm7 = vmor %vm817_vm3, %vm818_vm5 }
  0xb6   : > { %v801_v2 = vadd.f32 %v1334_v19, %v800_v49  ;;  %v836_v63 = vand.u32 2147483647, %v2294_v44  ;;  %1349 = vrcp.f32 %v2312_v42  ;;  %v838_v54 = vand.u32 2147483648, %v2294_v44 }
  0xb7   : > { %v1344_v0 = vpop.eup %1343  ;;  %v815_v4 = vmul.f32 %v1338_v11, %v814_v53  ;;  %v289_v5 = vadd.f32 %v1638_v10, %v251_v60  ;;  %v2335_v14 = vadd.f32 1.0, %v1342_v56  ;;  %1351 = vpow2.f32 %v1155_v1 }
  0xb8   : > { %v805_v3 = vsel %vm2307_vm4, %v1334_v19, %v801_v2  ;;  %v2337_v62 = vadd.f32 1.0, %v1344_v0  ;;  %v851_v18 = vand.u32 2147483647, %v2312_v42  ;;  %v853_v8 = vand.u32 2147483648, %v2312_v42 }
  0xb9   : > { %v810_v13 = vsel %vm2296_vm2, %v809_v52, %v805_v3  ;;  %v1346_v16 = vpop.eup %1345  ;;  %v816_v17 = vadd.f32 %v1338_v11, %v815_v4  ;;  %v252_v20 = vmul.f32 %v1634_v7, %v214_v55  ;;  %vm832_vm8 = vweird.f32 %v2294_v44 }
  0xba   : > { %1001 = vst [vmem:[%s1784_s20 + $0xc0] sm:$0xff] %v810_v13  ;;  %v828_v22 = vmul.f32 %v1346_v16, %v2294_v44  ;;  %1353 = vrcp.f32 %v2335_v14  ;;  %v2347_v21 = vmul.f32 %v1634_v7, %v215_v12  ;;  %vm2351_vm9 = vcmp.eq.f32.partialorder %v836_v63, 8.507059e+37 }
  0xbb   : > { %v1348_v9 = vpop.eup %1347  ;;  %v820_v23 = vsel %vm2331_vm7, %v1338_v11, %v816_v17  ;;  %1355 = vrcp.f32 %v2337_v62  ;;  %v1156_v25 = vmul.f32 -1.442695, %v289_v5  ;;  %vm833_vm10 = vweird.f32 %v1346_v16 }
  0xbc   : > { %v1350_v27 = vpop.eup %1349  ;;  %v825_v28 = vsel %vm2314_vm6, %v824_v59, %v820_v23  ;;  %v829_v15 = vsub.f32 1.0, %v828_v22  ;;  %v839_v26 = vor.u32 1.1754944e-38, %v838_v54  ;;  %vm847_vm11 = vweird.f32 %v2312_v42  ;;  %vm2371_vm14 = vmor %vm832_vm8, %vm833_vm10 }
  0xbd   : > { %1002 = vst [vmem:[%s1784_s20 + $0xc8] sm:$0xff] %v825_v28  ;;  %v843_v30 = vmul.f32 %v1350_v27, %v2312_v42  ;;  %vm2361_vm12 = vcmp.eq.f32.partialorder %v851_v18, 8.507059e+37  ;;  %v854_v19 = vor.u32 1.1754944e-38, %v853_v8  ;;  %v1352_v61 = vpop.eup %1351  ;;  %vm862_vm13 = vweird.f32 %v2335_v14  ;;  %v216_v18 = vld [vmem:[%s1621_s28 + $0x118] sm:$0xff] }
  0xbe   : > { %v830_v33 = vmul.f32 %v1346_v16, %v829_v15  ;;  %v866_v32 = vand.u32 2147483647, %v2335_v14  ;;  %v2367_v34 = vadd.f32 1.0, %v1348_v9  ;;  %vm848_vm15 = vweird.f32 %v1350_v27 }
  0xbf   : > { %v844_v36 = vsub.f32 1.0, %v843_v30  ;;  %v868_v37 = vand.u32 2147483648, %v2335_v14  ;;  %1357 = vpow2.f32 %v1156_v25  ;;  %vm877_vm0 = vweird.f32 %v2337_v62  ;;  %vm2387_vm1 = vmor %vm847_vm11, %vm848_vm15 }
  0xc0   : > { %v1354_v38 = vpop.eup %1353  ;;  %v831_v39 = vadd.f32 %v1346_v16, %v830_v33  ;;  %1359 = vrcp.f32 %v2367_v34  ;;  %v2378_v40 = vadd.f32 1.0, %v1352_v61  ;;  %v881_v44 = vand.u32 2147483647, %v2337_v62 }
  0xc1   : > { %v1356_v41 = vpop.eup %1355  ;;  %v845_v57 = vmul.f32 %v1350_v27, %v844_v36  ;;  %v858_v43 = vmul.f32 %v1354_v38, %v2335_v14  ;;  %v883_v11 = vand.u32 2147483648, %v2337_v62  ;;  %vm2391_vm2 = vcmp.eq.f32.partialorder %v866_v32, 8.507059e+37 }
  0xc2   : > { %v835_v45 = vsel %vm2371_vm14, %v1346_v16, %v831_v39  ;;  %v873_v47 = vmul.f32 %v1356_v41, %v2337_v62  ;;  %v290_v48 = vadd.f32 %v1638_v10, %v252_v20  ;;  %vm863_vm4 = vweird.f32 %v1354_v38 }
  0xc3   : > { %v840_v49 = vsel %vm2351_vm9, %v839_v26, %v835_v45  ;;  %v846_v50 = vadd.f32 %v1350_v27, %v845_v57  ;;  %v859_v60 = vsub.f32 1.0, %v858_v43  ;;  %v869_v51 = vor.u32 1.1754944e-38, %v868_v37  ;;  %vm2411_vm6 = vmor %vm862_vm13, %vm863_vm4 }
  0xc4   : > { %1003 = vst [vmem:[%s1784_s20 + $0xd0] sm:$0xff] %v840_v49  ;;  %v874_v52 = vsub.f32 1.0, %v873_v47  ;;  %vm878_vm3 = vweird.f32 %v1356_v41  ;;  %1361 = vrcp.f32 %v2378_v40  ;;  %vm2403_vm5 = vcmp.eq.f32.partialorder %v881_v44, 8.507059e+37 }
  0xc5   : > { %v1358_v42 = vpop.eup %1357  ;;  %v850_v1 = vsel %vm2387_vm1, %v1350_v27, %v846_v50  ;;  %v860_v2 = vmul.f32 %v1354_v38, %v859_v60  ;;  %v884_v56 = vor.u32 1.1754944e-38, %v883_v11  ;;  %v1157_v3 = vmul.f32 -1.442695, %v290_v48  ;;  %vm2421_vm7 = vmor %vm877_vm0, %vm878_vm3 }
  0xc6   : > { %v1360_v58 = vpop.eup %1359  ;;  %v855_v59 = vsel %vm2361_vm12, %v854_v19, %v850_v1  ;;  %v875_v55 = vmul.f32 %v1356_v41, %v874_v52  ;;  %v2415_v0 = vadd.f32 1.0, %v1358_v42  ;;  %vm892_vm8 = vweird.f32 %v2367_v34 }
  0xc7   : > { %1004 = vst [vmem:[%s1784_s20 + $0xd8] sm:$0xff] %v855_v59  ;;  %v861_v4 = vadd.f32 %v1354_v38, %v860_v2  ;;  %v888_v5 = vmul.f32 %v1360_v58, %v2367_v34  ;;  %v896_v12 = vand.u32 2147483647, %v2367_v34  ;;  %v898_v6 = vand.u32 2147483648, %v2367_v34 }
  0xc8   : > { %v876_v13 = vadd.f32 %v1356_v41, %v875_v55  ;;  %v911_v14 = vand.u32 2147483647, %v2378_v40  ;;  %1363 = vrcp.f32 %v2415_v0  ;;  %vm893_vm9 = vweird.f32 %v1360_v58 }
  0xc9   : > { %v865_v62 = vsel %vm2411_vm6, %v1354_v38, %v861_v4  ;;  %v889_v16 = vsub.f32 1.0, %v888_v5  ;;  %v913_v17 = vand.u32 2147483648, %v2378_v40  ;;  %1365 = vpow2.f32 %v1157_v3  ;;  %vm2448_vm10 = vmor %vm892_vm8, %vm893_vm9 }
  0xca   : > { %v1362_v8 = vpop.eup %1361  ;;  %v870_v20 = vsel %vm2391_vm2, %v869_v51, %v865_v62  ;;  %v880_v22 = vsel %vm2421_vm7, %v1356_v41, %v876_v13  ;;  %v291_v9 = vadd.f32 %v1638_v10, %v2347_v21  ;;  %vm2452_vm11 = vcmp.eq.f32.partialorder %v896_v12, 8.507059e+37 }
  0xcb   : > { %1005 = vst [vmem:[%s1784_s20 + $0xe0] sm:$0xff] %v870_v20  ;;  %v885_v23 = vsel %vm2403_vm5, %v884_v56, %v880_v22  ;;  %v890_v24 = vmul.f32 %v1360_v58, %v889_v16  ;;  %v903_v25 = vmul.f32 %v1362_v8, %v2378_v40  ;;  %v899_v15 = vor.u32 1.1754944e-38, %v898_v6 }
  0xcc   : > { %1006 = vst [vmem:[%s1784_s20 + $0xe8] sm:$0xff] %v885_v23  ;;  %v1158_v21 = vmul.f32 -1.442695, %v291_v9  ;;  %v254_v26 = vmul.f32 %v1634_v7, %v216_v18  ;;  %vm907_vm12 = vweird.f32 %v2378_v40  ;;  %vm908_vm13 = vweird.f32 %v1362_v8 }
  0xcd   : > { %v891_v30 = vadd.f32 %v1360_v58, %v890_v24  ;;  %v904_v31 = vsub.f32 1.0, %v903_v25  ;;  %vm2458_vm14 = vcmp.eq.f32.partialorder %v911_v14, 8.507059e+37  ;;  %v914_v33 = vor.u32 1.1754944e-38, %v913_v17  ;;  %vm909_vm0 = vmor %vm907_vm12, %vm908_vm13 }
  0xce   : > { %v1364_v19 = vpop.eup %1363  ;;  %1367 = vpow2.f32 %v1158_v21  ;;  %v292_v32 = vadd.f32 %v1638_v10, %v254_v26  ;;  %vm922_vm15 = vweird.f32 %v2415_v0  ;;  %v926_v38 = vand.u32 2147483647, %v2415_v0 }
  0xcf   : > { %v895_v34 = vsel %vm2448_vm10, %v1360_v58, %v891_v30  ;;  %v905_v35 = vmul.f32 %v1362_v8, %v904_v31  ;;  %v918_v7 = vmul.f32 %v1364_v19, %v2415_v0  ;;  %v1366_v36 = vpop.eup %1365  ;;  %v928_v39 = vand.u32 2147483648, %v2415_v0 }
  0xd0   : > { %v900_v37 = vsel %vm2452_vm11, %v899_v15, %v895_v34  ;;  %v1159_v40 = vmul.f32 -1.442695, %v292_v32  ;;  %vm923_vm1 = vweird.f32 %v1364_v19  ;;  %v434_v57 = vadd.f32 1.0, %v1366_v36 }
  0xd1   : > { %1007 = vst [vmem:[%s1784_s20 + $0xf0] sm:$0xff] %v900_v37  ;;  %v906_v10 = vadd.f32 %v1362_v8, %v905_v35  ;;  %v919_v41 = vsub.f32 1.0, %v918_v7  ;;  %vm924_vm2 = vmor %vm922_vm15, %vm923_vm1  ;;  %v929_v46 = vor.u32 1.1754944e-38, %v928_v39  ;;  %vm927_vm4 = vcmp.eq.f32.partialorder %v926_v38, 8.507059e+37 }
  0xd2   : > { %1369 = vpow2.f32 %v1159_v40  ;;  %v941_v42 = vand.u32 2147483647, %v434_v57  ;;  %v943_v1 = vand.u32 2147483648, %v434_v57  ;;  %vm937_vm3 = vweird.f32 %v434_v57 }
  0xd3   : > { %v910_v43 = vsel %vm909_vm0, %v1362_v8, %v906_v10  ;;  %v920_v44 = vmul.f32 %v1364_v19, %v919_v41  ;;  %1371 = vrcp.f32 %v434_v57 }
  0xd4   : > { %v1368_v11 = vpop.eup %1367  ;;  %v915_v45 = vsel %vm2458_vm14, %v914_v33, %v910_v43  ;;  %vm942_vm7 = vcmp.eq.f32.partialorder %v941_v42, 8.507059e+37  ;;  %v944_v63 = vor.u32 1.1754944e-38, %v943_v1 }
  0xd5   : > { %1008 = vst [vmem:[%s1784_s20 + $0xf8] sm:$0xff] %v915_v45  ;;  %v921_v29 = vadd.f32 %v1364_v19, %v920_v44  ;;  %v435_v47 = vadd.f32 1.0, %v1368_v11 }
  0xd7   : > { %v925_v48 = vsel %vm924_vm2, %v1364_v19, %v921_v29  ;;  %1373 = vrcp.f32 %v435_v47  ;;  %v956_v59 = vand.u32 2147483647, %v435_v47  ;;  %v958_v55 = vand.u32 2147483648, %v435_v47 }
  0xd8   : > { %v1370_v49 = vpop.eup %1369  ;;  %v930_v50 = vsel %vm927_vm4, %v929_v46, %v925_v48  ;;  %vm952_vm8 = vweird.f32 %v435_v47 }
  0xd9   : > { %v1372_v60 = vpop.eup %1371  ;;  %1009 = vst [vmem:[%s1784_s20 + $0x100] sm:$0xff] %v930_v50  ;;  %v436_v51 = vadd.f32 1.0, %v1370_v49  ;;  %vm2479_vm10 = vcmp.eq.f32.partialorder %v956_v59, 8.507059e+37  ;;  %v959_v14 = vor.u32 1.1754944e-38, %v958_v55 }
  0xda   : > { %v933_v52 = vmul.f32 %v1372_v60, %v434_v57  ;;  %vm938_vm5 = vweird.f32 %v1372_v60 }
  0xdb   : > { %1375 = vrcp.f32 %v436_v51  ;;  %vm939_vm6 = vmor %vm937_vm3, %vm938_vm5  ;;  %vm967_vm12 = vweird.f32 %v436_v51  ;;  %v973_v62 = vand.u32 2147483648, %v436_v51  ;;  %v971_v18 = vand.u32 2147483647, %v436_v51 }
  0xdc   : > { %v934_v2 = vsub.f32 1.0, %v933_v52 }
  0xdd   : > { %v1374_v53 = vpop.eup %1373  ;;  %v974_v9 = vor.u32 1.1754944e-38, %v973_v62  ;;  %vm972_vm15 = vcmp.eq.f32.partialorder %v971_v18, 8.507059e+37 }
  0xde   : > { %v935_v56 = vmul.f32 %v1372_v60, %v934_v2  ;;  %v948_v58 = vmul.f32 %v1374_v53, %v435_v47  ;;  %vm953_vm9 = vweird.f32 %v1374_v53 }
  0xdf   : > { %vm954_vm11 = vmor %vm952_vm8, %vm953_vm9 }
  0xe0   : > { %v936_v0 = vadd.f32 %v1372_v60, %v935_v56  ;;  %v949_v3 = vsub.f32 1.0, %v948_v58 }
  0xe1   : > { %v1376_v4 = vpop.eup %1375 }
  0xe2   : > { %v940_v54 = vsel %vm939_vm6, %v1372_v60, %v936_v0  ;;  %v950_v5 = vmul.f32 %v1374_v53, %v949_v3  ;;  %v963_v13 = vmul.f32 %v1376_v4, %v436_v51  ;;  %vm968_vm13 = vweird.f32 %v1376_v4 }
  0xe3   : > { %v945_v6 = vsel %vm942_vm7, %v944_v63, %v940_v54  ;;  %vm969_vm14 = vmor %vm967_vm12, %vm968_vm13 }
  0xe4   : > { %1010 = vst [vmem:[%s1784_s20 + $0x108] sm:$0xff] %v945_v6  ;;  %v951_v16 = vadd.f32 %v1374_v53, %v950_v5  ;;  %v964_v17 = vsub.f32 1.0, %v963_v13 }
  0xe6   : > { %v955_v8 = vsel %vm954_vm11, %v1374_v53, %v951_v16  ;;  %v965_v20 = vmul.f32 %v1376_v4, %v964_v17 }
  0xe7   : > { %v960_v22 = vsel %vm2479_vm10, %v959_v14, %v955_v8 }
  0xe8   : > { %1011 = vst [vmem:[%s1784_s20 + $0x110] sm:$0xff] %v960_v22  ;;  %v966_v23 = vadd.f32 %v1376_v4, %v965_v20 }
  0xea   : > { %v970_v24 = vsel %vm969_vm14, %v1376_v4, %v966_v23 }
  0xeb   : > { %v975_v25 = vsel %vm972_vm15, %v974_v9, %v970_v24 }
  0xec   : > { %1012 = vst [vmem:[%s1784_s20 + $0x118] sm:$0xff] %v975_v25 }
  0xed   : > { %1449 = shalt.err (!%p1446_p8)
}
  0xee   : > { %s1497_s4 = smov 512   ;;  %s1498_s7 = smov 32  }
  0xef   : > { %1178 = dma.vmem_to_hbm [thread:$0]  (%p1566_p11), %s1028_s17, 4608, %s1030_s19, %s1014_s24, %s1497_s4, %s1497_s4, %s1498_s7  }
  0xf0 PF: > { %s1044_s28 = sand.u32 1, %s1480_s9   ;;  %p2653_p9 = scmp.ge.s32.totalorder %s1492_s12, 2 }
  0xf1   : > { %s1045_s23 = scalar_lea.sflag [#allocation4], %s1044_s28 }
  0xf2   : > { %p1189_p10 = pnand %p2653_p9, %p1570_p12 }
  0xf4   : > { %p1190_p1 = pneg %p1189_p10 }
  0xf6   : > { %1475 = dma.done.wait (%p1190_p1), %s1045_s23, 4608  }
  0xf7   : > { %1477 = vsyncadd (%p1190_p1), %s1045_s23, 4294962688  ;;  %p16_p2 = scmp.ge.s32.totalorder %s1539_s15, 4   ;;  %s2654_s9 = smov %s1484_s10 }
  0xf8   : > { %s2655_s10 = smov %s1488_s11  ;;  %s2656_s11 = smov %s1551_s18 }
  0xf9   : > { %s2657_s12 = smov %s1539_s15  ;;  %18 = sbr.rel (!%p16_p2) target bundleno = 6 (0x6), region = 78 }
  0xfe   :  { %1051 = vsyncpa [#allocation3], 1 }
  0xff   :  { %1053 = vsyncpa [#allocation3 + $0x1], 1 }
 0x100   :  { %1054 = vsyncpa [#allocation4], 1 }
 0x101   :  { %1056 = vsyncpa [#allocation4 + $0x1], 1 }
 0x102   :  { %1057 = vsyncpa [#allocation5], 1 }
 0x103   :  { %1059 = vsyncpa [#allocation5 + $0x1], 1 }

</bundles_post_ra>
